<compile_context>
chip_gen: v7x
topology: tpu7x:2x2x1
jax: 0.10.0
libtpu: 0.0.40
codegen_flags: <defaults>
</compile_context>

<pallas_src>
import functools
import math

import jax
import jax.numpy as jnp
from jax.experimental import pallas as pl
from jax.experimental.pallas import tpu as pltpu

LANE = 128
SUBLANE = 8
_STAGE_H_SCRATCH_MIN_TB = 256   # stage h1/h2 in VMEM scratch only at big tiles


def _round_up(x, m):
    return (x + m - 1) // m * m


def _xavier_uniform(key, fan_in, fan_out, dtype=jnp.float32):
    """Matches the PyTorch `Xavier` helper: U(-a, a), a = sqrt(3)*sqrt(2/(fan_in+fan_out))."""
    std = 1.0 * math.sqrt(2.0 / (fan_in + fan_out))
    a = math.sqrt(3.0) * std
    # stored as (in_features, out_features) so the kernel computes x @ W + b
    return jax.random.uniform(key, (fan_in, fan_out), dtype=dtype, minval=-a, maxval=a)


def init_mlp_params(key, input_size, num_classes, dtype=jnp.float32):
    """f32 master parameters, matching MLP.initialize() (Xavier weights, zero biases)."""
    k1, k2, k3 = jax.random.split(key, 3)
    w1 = _xavier_uniform(k1, input_size, 400, dtype)
    b1 = jnp.zeros((400,), dtype)
    w2 = _xavier_uniform(k2, 400, 200, dtype)
    b2 = jnp.zeros((200,), dtype)
    w3 = _xavier_uniform(k3, 200, num_classes, dtype)
    b3 = jnp.zeros((num_classes,), dtype)
    return (w1, b1, w2, b2, w3, b3)


def pack_params(params, *, compute_dtype=jnp.bfloat16):
    """Zero-pad matmul OUTPUT dims (H1, H2, C) to 128-lane multiples and cast
    weights to the MXU compute dtype (biases stay f32 for the VPU bias-add).
    The contraction dim of layer 1 (input_size) is left unpadded: the MXU
    handles arbitrary K and this avoids a wrapper-side pad pass on x.
    Padded weight rows/columns and bias lanes are zero, so padded activation
    lanes are exactly 0 after bias-add/ReLU and never leak downstream."""
    w1, b1, w2, b2, w3, b3 = params
    D, H1 = w1.shape
    H2 = w2.shape[1]
    C = w3.shape[1]
    H1p, H2p, Cp = (_round_up(d, LANE) for d in (H1, H2, C))

    def pad_b(b, cp):
        return jnp.pad(b, (0, cp - b.shape[0])).reshape(1, cp).astype(jnp.float32)

    w1p = jnp.pad(w1, ((0, 0), (0, H1p - H1))).astype(compute_dtype)
    w2p = jnp.pad(w2, ((0, H1p - H1), (0, H2p - H2))).astype(compute_dtype)
    w3p = jnp.pad(w3, ((0, H2p - H2), (0, Cp - C))).astype(compute_dtype)

    packed = (w1p, pad_b(b1, H1p),
              w2p, pad_b(b2, H2p),
              w3p, pad_b(b3, Cp))
    dims = dict(D=D, H1=H1, H2=H2, C=C, H1p=H1p, H2p=H2p, Cp=Cp)
    return packed, dims


def _mlp_kernel(x_ref, w1_ref, b1_ref, w2_ref, b2_ref, w3_ref, b3_ref,
                o_ref, *scratch, compute_dtype=jnp.bfloat16):
    """Fused hot path: 3 MXU matmuls (bf16 operands, f32 accumulate) with
    f32 bias-add/ReLU on the VPU.  h1/h2 stay in vregs at small tiles; at
    large tiles (scratch present) they round-trip through VMEM scratch."""
    h1_ref, h2_ref = scratch if scratch else (None, None)

    x = x_ref[...].astype(compute_dtype)                      # per-tile cast for the MXU
    h1 = jnp.dot(x, w1_ref[...], preferred_element_type=jnp.float32) + b1_ref[...]
    h1 = jnp.maximum(h1, 0.0).astype(compute_dtype)
    if h1_ref is not None:
        h1_ref[...] = h1
        h1 = h1_ref[...]

    h2 = jnp.dot(h1, w2_ref[...], preferred_element_type=jnp.float32) + b2_ref[...]
    h2 = jnp.maximum(h2, 0.0).astype(compute_dtype)
    if h2_ref is not None:
        h2_ref[...] = h2
        h2 = h2_ref[...]

    out = jnp.dot(h2, w3_ref[...], preferred_element_type=jnp.float32) + b3_ref[...]
    o_ref[...] = out.astype(o_ref.dtype)


def _num_tensorcores_per_chip():
    """Best-effort megacore detection; defaults to 1 (single TC) on failure."""
    try:
        d = jax.devices()[0]
        n = getattr(d, "num_cores", None)
        if n:
            return int(n)
        kind = str(getattr(d, "device_kind", "")).lower()
        if "v7" in kind:
            return 2
    except Exception:
        pass
    return 1


def _choose_batch_tile(B, num_cores=1):
    cap = 512
    if B <= 16:
        # tiny batch: one grid step, minimal sublane-aligned tile
        return max(SUBLANE, _round_up(B, SUBLANE))
    if num_cores >= 2:
        # megacore (v7x): keep >=2 grid steps so the "parallel" axis shards
        # across both TensorCores; 16-row aligned for bf16 sublane packing.
        tb = _round_up(pl.cdiv(B, 2), 16)
    else:
        # single TC (v5e/v6e): one big tile when it fits; splitting only adds
        # ~0.35 us of per-step overhead with no parallelism benefit.
        tb = _round_up(B, 16)
    return max(16, min(cap, tb))


def mlp_forward(x, packed_params, dims, *, batch_tile=None,
                compute_dtype=jnp.bfloat16, out_dtype=jnp.bfloat16):
    """Run the fused MLP kernel. x: (B, input_size). Returns (B, num_classes)."""
    w1p, b1p, w2p, b2p, w3p, b3p = packed_params
    B, D = x.shape
    assert D == dims["D"], "input feature size mismatch"
    H1p, H2p, Cp, C = dims["H1p"], dims["H2p"], dims["Cp"], dims["C"]

    tb = batch_tile if batch_tile is not None else _choose_batch_tile(
        B, _num_tensorcores_per_chip())
    grid = (pl.cdiv(B, tb),)

    use_staging = tb >= _STAGE_H_SCRATCH_MIN_TB
    scratch_shapes = (
        [pltpu.VMEM((tb, H1p), compute_dtype),
         pltpu.VMEM((tb, H2p), compute_dtype)]
        if use_staging else []
    )

    kernel = functools.partial(_mlp_kernel, compute_dtype=compute_dtype)

    flops = 2 * B * (D * H1p + H1p * H2p + H2p * Cp)
    bytes_accessed = (
        x.size * x.dtype.itemsize
        + sum(p.size * p.dtype.itemsize for p in packed_params)
        + B * Cp * jnp.dtype(out_dtype).itemsize
    )

    out_padded = pl.pallas_call(
        kernel,
        out_shape=jax.ShapeDtypeStruct((B, Cp), out_dtype),
        grid_spec=pltpu.PrefetchScalarGridSpec(
            num_scalar_prefetch=0,
            grid=grid,
            in_specs=[
                pl.BlockSpec((tb, D), lambda i: (i, 0)),      # x: streamed over batch
                pl.BlockSpec((D, H1p), lambda i: (0, 0)),     # W1: resident
                pl.BlockSpec((1, H1p), lambda i: (0, 0)),     # b1 (f32)
                pl.BlockSpec((H1p, H2p), lambda i: (0, 0)),   # W2: resident
                pl.BlockSpec((1, H2p), lambda i: (0, 0)),     # b2 (f32)
                pl.BlockSpec((H2p, Cp), lambda i: (0, 0)),    # W3: resident
                pl.BlockSpec((1, Cp), lambda i: (0, 0)),      # b3 (f32)
            ],
            out_specs=pl.BlockSpec((tb, Cp), lambda i: (i, 0)),  # lane-dense output tile
            scratch_shapes=scratch_shapes,
        ),
        compiler_params=pltpu.CompilerParams(
            dimension_semantics=("parallel",),
        ),
        cost_estimate=pl.CostEstimate(
            flops=flops, transcendentals=0, bytes_accessed=bytes_accessed),
    )(x, w1p, b1p, w2p, b2p, w3p, b3p)

    return out_padded[:, :C]


def mlp_reference_bf16(x, params, compute_dtype=jnp.bfloat16):
    """Pure-JAX reference mirroring the kernel's bf16-operand / f32-accumulate math."""
    w1, b1, w2, b2, w3, b3 = params
    c = compute_dtype
    h1 = jnp.dot(x.astype(c), w1.astype(c), preferred_element_type=jnp.float32) + b1
    h1 = jnp.maximum(h1, 0.0)
    h2 = jnp.dot(h1.astype(c), w2.astype(c), preferred_element_type=jnp.float32) + b2
    h2 = jnp.maximum(h2, 0.0)
    return jnp.dot(h2.astype(c), w3.astype(c), preferred_element_type=jnp.float32) + b3


def mlp_reference_f32(x, params):
    """Exact f32 reference of the original PyTorch forward."""
    w1, b1, w2, b2, w3, b3 = params
    h1 = jnp.maximum(x @ w1 + b1, 0.0)
    h2 = jnp.maximum(h1 @ w2 + b2, 0.0)
    return h2 @ w3 + b3


if __name__ == "__main__":
    key = jax.random.PRNGKey(0)
    kx, kp = jax.random.split(key)

    batch = 8
    input_size = 32
    num_classes = 10

    x = jax.random.normal(kx, (batch, input_size), dtype=jnp.float32)
    params = init_mlp_params(kp, input_size, num_classes)
    packed, dims = pack_params(params, compute_dtype=jnp.bfloat16)

    out = mlp_forward(x, packed, dims)
    out = jax.block_until_ready(out)
    assert out.shape == (batch, num_classes)
    out_f32 = out.astype(jnp.float32)

    # Primary check: against a reference mirroring the kernel's bf16-operand,
    # f32-accumulate math (tolerance covers the final bf16 output cast).
    ref_bf16 = mlp_reference_bf16(x, params)
    assert jnp.allclose(out_f32, ref_bf16, atol=2e-2, rtol=2e-2), \
        "mismatch vs bf16-mirrored reference"

    # Sanity check of forward semantics vs the exact f32 reference
    # (loose tolerance accounts for bf16 MXU operand / output rounding).
    ref_f32 = mlp_reference_f32(x, params)
    assert jnp.allclose(out_f32, ref_f32, atol=1e-1, rtol=1e-1), \
        "mismatch vs f32 reference"

    print("KERNEL_OK")
</pallas_src>

<mosaic_0001>
module attributes {stable_mosaic.version = 11 : i64} {
  func.func @_mlp_kernel(%arg0: i32, %arg1: memref<8x32xf32, #tpu.memory_space<vmem>>, %arg2: memref<32x512xbf16, #tpu.memory_space<vmem>>, %arg3: memref<1x512xf32, #tpu.memory_space<vmem>>, %arg4: memref<512x256xbf16, #tpu.memory_space<vmem>>, %arg5: memref<1x256xf32, #tpu.memory_space<vmem>>, %arg6: memref<256x128xbf16, #tpu.memory_space<vmem>>, %arg7: memref<1x128xf32, #tpu.memory_space<vmem>>, %arg8: memref<8x128xbf16, #tpu.memory_space<vmem>>) attributes {dimension_semantics = [#tpu.dimension_semantics<parallel>], iteration_bounds = array<i64: 1>, scalar_prefetch = 0 : i64, scratch_operands = 0 : i64, tpu.core_type = #tpu.core_type<tc>, window_params = [{transform_indices = @transform_0, window_bounds = array<i64: 8, 32>}, {pipeline_mode = #tpu.pipeline_mode<synchronous>, transform_indices = @transform_1, window_bounds = array<i64: 32, 512>}, {pipeline_mode = #tpu.pipeline_mode<synchronous>, transform_indices = @transform_2, window_bounds = array<i64: 1, 512>}, {pipeline_mode = #tpu.pipeline_mode<synchronous>, transform_indices = @transform_3, window_bounds = array<i64: 512, 256>}, {pipeline_mode = #tpu.pipeline_mode<synchronous>, transform_indices = @transform_4, window_bounds = array<i64: 1, 256>}, {pipeline_mode = #tpu.pipeline_mode<synchronous>, transform_indices = @transform_5, window_bounds = array<i64: 256, 128>}, {pipeline_mode = #tpu.pipeline_mode<synchronous>, transform_indices = @transform_6, window_bounds = array<i64: 1, 128>}, {transform_indices = @transform_7, window_bounds = array<i64: 8, 128>}]} {
    %c0 = arith.constant 0 : index
    %c0_0 = arith.constant 0 : index
    %0 = vector.load %arg1[%c0, %c0_0] : memref<8x32xf32, #tpu.memory_space<vmem>>, vector<8x32xf32>
    %1 = arith.truncf %0 : vector<8x32xf32> to vector<8x32xbf16>
    %c0_1 = arith.constant 0 : index
    %c0_2 = arith.constant 0 : index
    %2 = vector.load %arg2[%c0_1, %c0_2] : memref<32x512xbf16, #tpu.memory_space<vmem>>, vector<32x512xbf16>
    %cst = arith.constant dense<0.000000e+00> : vector<8x512xf32>
    %3 = tpu.matmul %1, %2, %cst {dimension_numbers = #tpu.dot_dimension_numbers<[1], [0], [0], [1], [0, 0, 1, 1], [], []>} : vector<8x32xbf16>, vector<32x512xbf16>, vector<8x512xf32> -> vector<8x512xf32>
    %c0_3 = arith.constant 0 : index
    %c0_4 = arith.constant 0 : index
    %4 = vector.load %arg3[%c0_3, %c0_4] : memref<1x512xf32, #tpu.memory_space<vmem>>, vector<1x512xf32>
    %5 = vector.broadcast %4 : vector<1x512xf32> to vector<8x512xf32>
    %6 = arith.addf %3, %5 : vector<8x512xf32>
    %cst_5 = arith.constant 0.000000e+00 : f32
    %7 = vector.broadcast %cst_5 : f32 to vector<8x512xf32>
    %8 = arith.maximumf %6, %7 : vector<8x512xf32>
    %9 = arith.truncf %8 : vector<8x512xf32> to vector<8x512xbf16>
    %c0_6 = arith.constant 0 : index
    %c0_7 = arith.constant 0 : index
    %10 = vector.load %arg4[%c0_6, %c0_7] : memref<512x256xbf16, #tpu.memory_space<vmem>>, vector<512x256xbf16>
    %cst_8 = arith.constant dense<0.000000e+00> : vector<8x256xf32>
    %11 = tpu.matmul %9, %10, %cst_8 {dimension_numbers = #tpu.dot_dimension_numbers<[1], [0], [0], [1], [0, 0, 1, 1], [], []>} : vector<8x512xbf16>, vector<512x256xbf16>, vector<8x256xf32> -> vector<8x256xf32>
    %c0_9 = arith.constant 0 : index
    %c0_10 = arith.constant 0 : index
    %12 = vector.load %arg5[%c0_9, %c0_10] : memref<1x256xf32, #tpu.memory_space<vmem>>, vector<1x256xf32>
    %13 = vector.broadcast %12 : vector<1x256xf32> to vector<8x256xf32>
    %14 = arith.addf %11, %13 : vector<8x256xf32>
    %cst_11 = arith.constant 0.000000e+00 : f32
    %15 = vector.broadcast %cst_11 : f32 to vector<8x256xf32>
    %16 = arith.maximumf %14, %15 : vector<8x256xf32>
    %17 = arith.truncf %16 : vector<8x256xf32> to vector<8x256xbf16>
    %c0_12 = arith.constant 0 : index
    %c0_13 = arith.constant 0 : index
    %18 = vector.load %arg6[%c0_12, %c0_13] : memref<256x128xbf16, #tpu.memory_space<vmem>>, vector<256x128xbf16>
    %cst_14 = arith.constant dense<0.000000e+00> : vector<8x128xf32>
    %19 = tpu.matmul %17, %18, %cst_14 {dimension_numbers = #tpu.dot_dimension_numbers<[1], [0], [0], [1], [0, 0, 1, 1], [], []>} : vector<8x256xbf16>, vector<256x128xbf16>, vector<8x128xf32> -> vector<8x128xf32>
    %c0_15 = arith.constant 0 : index
    %c0_16 = arith.constant 0 : index
    %20 = vector.load %arg7[%c0_15, %c0_16] : memref<1x128xf32, #tpu.memory_space<vmem>>, vector<1x128xf32>
    %21 = vector.broadcast %20 : vector<1x128xf32> to vector<8x128xf32>
    %22 = arith.addf %19, %21 : vector<8x128xf32>
    %23 = arith.truncf %22 : vector<8x128xf32> to vector<8x128xbf16>
    %c0_17 = arith.constant 0 : index
    %c0_18 = arith.constant 0 : index
    %24 = vector.load %arg8[%c0_17, %c0_18] : memref<8x128xbf16, #tpu.memory_space<vmem>>, vector<8x128xbf16>
    tpu.vector_store %arg8[%c0_17, %c0_18], %23 {strides = array<i32>} : memref<8x128xbf16, #tpu.memory_space<vmem>>, vector<8x128xbf16>,
    return
  }
  func.func @transform_0(%arg0: i32) -> (i32, i32) {
    %c0_i32 = arith.constant 0 : i32
    %c0_i32_0 = arith.constant 0 : i32
    return %arg0, %c0_i32 : i32, i32
  }
  func.func @transform_1(%arg0: i32) -> (i32, i32) {
    %c0_i32 = arith.constant 0 : i32
    %c0_i32_0 = arith.constant 0 : i32
    %c0_i32_1 = arith.constant 0 : i32
    return %c0_i32, %c0_i32_0 : i32, i32
  }
  func.func @transform_2(%arg0: i32) -> (i32, i32) {
    %c0_i32 = arith.constant 0 : i32
    %c0_i32_0 = arith.constant 0 : i32
    %c0_i32_1 = arith.constant 0 : i32
    return %c0_i32, %c0_i32_0 : i32, i32
  }
  func.func @transform_3(%arg0: i32) -> (i32, i32) {
    %c0_i32 = arith.constant 0 : i32
    %c0_i32_0 = arith.constant 0 : i32
    %c0_i32_1 = arith.constant 0 : i32
    return %c0_i32, %c0_i32_0 : i32, i32
  }
  func.func @transform_4(%arg0: i32) -> (i32, i32) {
    %c0_i32 = arith.constant 0 : i32
    %c0_i32_0 = arith.constant 0 : i32
    %c0_i32_1 = arith.constant 0 : i32
    return %c0_i32, %c0_i32_0 : i32, i32
  }
  func.func @transform_5(%arg0: i32) -> (i32, i32) {
    %c0_i32 = arith.constant 0 : i32
    %c0_i32_0 = arith.constant 0 : i32
    %c0_i32_1 = arith.constant 0 : i32
    return %c0_i32, %c0_i32_0 : i32, i32
  }
  func.func @transform_6(%arg0: i32) -> (i32, i32) {
    %c0_i32 = arith.constant 0 : i32
    %c0_i32_0 = arith.constant 0 : i32
    %c0_i32_1 = arith.constant 0 : i32
    return %c0_i32, %c0_i32_0 : i32, i32
  }
  func.func @transform_7(%arg0: i32) -> (i32, i32) {
    %c0_i32 = arith.constant 0 : i32
    %c0_i32_0 = arith.constant 0 : i32
    return %arg0, %c0_i32 : i32, i32
  }
}

</mosaic_0001>

<bundles_post_ra>
// kernel: tpu_custom_call.1
= control target key start
LH: loop header
LB: loop body
LE: loop exit
PB: predicated region body
PF: predicated region fallthrough
CT: control target
= control target key end

     0   :  { %12 = vsyncpa [#allocation3], 0  ;;  %s1431_s0 = inlined_call_operand.hbm [shape: f32[8,32], index: 0, kind: input, shape index: {}]   ;;  %s1432_s1 = inlined_call_operand.hbm [shape: bf16[32,512], index: 1, kind: input, shape index: {}]   ;;  %s1433_s2 = inlined_call_operand.vmem [shape: f32[1,512], index: 2, kind: input, shape index: {}]   ;;  %s1434_s3 = inlined_call_operand.hbm [shape: bf16[512,256], index: 3, kind: input, shape index: {}]   ;;  %s1435_s4 = inlined_call_operand.vmem [shape: f32[1,256], index: 4, kind: input, shape index: {}]   ;;  %s1436_s5 = inlined_call_operand.hbm [shape: bf16[256,128], index: 5, kind: input, shape index: {}]   ;;  %s1437_s6 = inlined_call_operand.vmem [shape: f32[1,128], index: 6, kind: input, shape index: {}]   ;;  %s1438_s7 = inlined_call_operand.hbm [shape: bf16[8,128], index: 7, kind: output, shape index: {}]  }
   0x1   :  { %13 = vsyncpa [#allocation6], 0 }
   0x2   :  { %14 = vsyncpa [#allocation9], 0 }
   0x3   :  { %15 = vsyncpa [#allocation4], 0  ;;  %s1294_s24 = smov [#allocation5]   ;;  %s1176_s28 = scalar_lea.hbm %s1432_s1, 1024 }
   0x4   :  { %s31_s25 = sshll.u32 %s1294_s24, 4  ;;  %p1177_p0 = scmp.ne.s32.totalorder %s1432_s1, %s1176_s28  ;;  %s32_s25 = int_to_ptr.vmem [resolvable:$true] %s31_s25 }
   0x5   :  { %p1180_p1 = scmp.lt.u32.totalorder %s1176_s28, %s1432_s1 }
   0x7   :  { %p1182_p2 = pnand %p1180_p1, %p1177_p0 }
   0x9   :  { %1185 = shalt.err (!%p1182_p2)
}
   0xa   :  { %s1186_s10 = scalar_lea.vmem %s32_s25, 1024  ;;  %p1191_p4 = scmp.lt.s32.totalorder %s32_s25, %s32_s25 }
   0xb   :  { %p1187_p3 = scmp.ne.s32.totalorder %s32_s25, %s1186_s10  ;;  %p1192_p5 = scmp.lt.s32.totalorder %s1186_s10, %s1186_s10 }
   0xd   :  { %p1193_p6 = por %p1192_p5, %p1191_p4 }
   0xf   :  { %p1194_p7 = pnand %p1193_p6, %p1187_p3 }
  0x11   :  { %1197 = shalt.err (!%p1194_p7)
}
  0x12   :  { %s1295_s11 = smov 256   ;;  %s1296_s12 = smov 16  }
  0x13   :  { %37 = dma.hbm_to_vmem [thread:$0]  %s1432_s1, 1024, %s32_s25, [#allocation6], %s1295_s11, %s1295_s11, %s1296_s12  }
  0x14   :  { %s1297_s15 = smov [#allocation2]   ;;  %s1298_s17 = smov [#allocation7]  }
  0x15   :  { %s22_s16 = sshll.u32 %s1297_s15, 4  ;;  %s45_s18 = sshll.u32 %s1298_s17, 4  ;;  %s23_s16 = int_to_ptr.vmem [resolvable:$true] %s22_s16  ;;  %s46_s18 = int_to_ptr.vmem [resolvable:$true] %s45_s18 }
  0x16   :  { %s1198_s21 = scalar_lea.hbm %s1431_s0, 128 }
  0x17   :  { %p1199_p8 = scmp.ne.s32.totalorder %s1431_s0, %s1198_s21  ;;  %p1202_p9 = scmp.lt.u32.totalorder %s1198_s21, %s1431_s0 }
  0x19   :  { %p1204_p10 = pnand %p1202_p9, %p1199_p8 }
  0x1b   :  { %1207 = shalt.err (!%p1204_p10)
}
  0x1c   :  { %s1208_s1 = scalar_lea.vmem %s23_s16, 128  ;;  %p1213_p12 = scmp.lt.s32.totalorder %s23_s16, %s23_s16 }
  0x1d   :  { %p1209_p11 = scmp.ne.s32.totalorder %s23_s16, %s1208_s1  ;;  %p1214_p13 = scmp.lt.s32.totalorder %s1208_s1, %s1208_s1 }
  0x1f   :  { %p1215_p0 = por %p1214_p13, %p1213_p12 }
  0x21   :  { %p1216_p1 = pnand %p1215_p0, %p1209_p11 }
  0x23   :  { %1219 = shalt.err (!%p1216_p1)
}
  0x24   :  { %25 = dma.hbm_to_vmem [thread:$0]  %s1431_s0, 128, %s23_s16, [#allocation3]  }
  0x25   :  { %s1220_s30 = scalar_lea.hbm %s1434_s3, 8192 }
  0x26   :  { %p1221_p2 = scmp.ne.s32.totalorder %s1434_s3, %s1220_s30  ;;  %p1224_p3 = scmp.lt.u32.totalorder %s1220_s30, %s1434_s3 }
  0x28   :  { %p1226_p4 = pnand %p1224_p3, %p1221_p2 }
  0x2a   :  { %1229 = shalt.err (!%p1226_p4)
}
  0x2b   :  { %s1230_s12 = scalar_lea.vmem %s46_s18, 8192  ;;  %p1235_p6 = scmp.lt.s32.totalorder %s46_s18, %s46_s18 }
  0x2c   :  { %p1231_p5 = scmp.ne.s32.totalorder %s46_s18, %s1230_s12  ;;  %p1236_p7 = scmp.lt.s32.totalorder %s1230_s12, %s1230_s12 }
  0x2e   :  { %p1237_p8 = por %p1236_p7, %p1235_p6 }
  0x30   :  { %p1238_p9 = pnand %p1237_p8, %p1231_p5 }
  0x32   :  { %1241 = shalt.err (!%p1238_p9)
}
  0x33   :  { %s1299_s0 = smov 128   ;;  %s1300_s13 = smov 8  }
  0x34   :  { %51 = dma.hbm_to_vmem [thread:$0]  %s1434_s3, 8192, %s46_s18, [#allocation6], %s1299_s0, %s1299_s0, %s1300_s13  }
  0x35   :  { %s1301_s16 = smov [#allocation8]   ;;  %s1242_s21 = scalar_lea.hbm %s1436_s5, 2048 }
  0x36   :  { %s59_s17 = sshll.u32 %s1301_s16, 4  ;;  %p1243_p10 = scmp.ne.s32.totalorder %s1436_s5, %s1242_s21  ;;  %s60_s17 = int_to_ptr.vmem [resolvable:$true] %s59_s17 }
  0x37   :  { %p1246_p11 = scmp.lt.u32.totalorder %s1242_s21, %s1436_s5 }
  0x39   :  { %p1248_p12 = pnand %p1246_p11, %p1243_p10 }
  0x3b   :  { %1251 = shalt.err (!%p1248_p12)
}
  0x3c   :  { %s1252_s1 = scalar_lea.vmem %s60_s17, 2048  ;;  %p1257_p0 = scmp.lt.s32.totalorder %s60_s17, %s60_s17 }
  0x3d   :  { %p1253_p13 = scmp.ne.s32.totalorder %s60_s17, %s1252_s1  ;;  %p1258_p1 = scmp.lt.s32.totalorder %s1252_s1, %s1252_s1 }
  0x3f   :  { %p1259_p2 = por %p1258_p1, %p1257_p0 }
  0x41   :  { %p1260_p3 = pnand %p1259_p2, %p1253_p13 }
  0x43   :  { %1263 = shalt.err (!%p1260_p3)
}
  0x44   :  { %s1302_s3 = smov 64   ;;  %s1303_s18 = smov 4  }
  0x45   :  { %65 = dma.hbm_to_vmem [thread:$0]  %s1436_s5, 2048, %s60_s17, [#allocation9], %s1302_s3, %s1302_s3, %s1303_s18  }
  0x46   :  { %1286 = dma.done.wait [#allocation3], 128  }
  0x47   :  { %1287 = vsyncadd [#allocation3], 4294967168 }
  0x48   :  { %1288 = dma.done.wait [#allocation6], 9216  }
  0x49   :  { %1289 = vsyncadd [#allocation6], 4294958080 }
  0x4a   :  { %1290 = dma.done.wait [#allocation9], 2048  }
  0x4b   :  { %1291 = vsyncadd [#allocation9], 4294965248  ;;  %v1304_v0 = vmov 0   ;;  %v1052_v1 = vld [vmem:[#allocation5 + $0x4] ss:$16 sps:$4 sm:$0xff]   ;;  %v81_v5 = vld [vmem:[#allocation2] sm:$0xff] }
  0x4c   :  { %189 = vmatprep.mubr.bf16.mxu0 %v1304_v0  ;;  %v1054_v2 = vld [vmem:[#allocation5] ss:$16 sps:$4 sm:$0xff]   ;;  %157 = vmatprep.subr.bf16.mxu0 %v1052_v1  ;;  %v1055_v3 = vld [vmem:[#allocation5 + $0x24] ss:$16 sps:$4 sm:$0xff]   ;;  %v1060_v6 = vld [vmem:[#allocation5 + $0xc] ss:$16 sps:$4 sm:$0xff]   ;;  %v82_v8 = vpack.c.bf16 %v81_v5, %v81_v5 }
  0x4d   :  { %v1057_v4 = vld [vmem:[#allocation5 + $0x20] ss:$16 sps:$4 sm:$0xff]   ;;  %158 = vmatpush1.bf16.msra.mxu0 %v1054_v2  ;;  %v1058_v7 = vld [vmem:[#allocation5 + $0x8] ss:$16 sps:$4 sm:$0xff]   ;;  %v1064_v9 = vld [vmem:[#allocation7 + $0x4] ss:$8 sps:$4 sm:$0xff]  }
  0x4e   :  { %159 = vmatprep.subr.bf16.mxu0 %v1055_v3  ;;  %v1066_v10 = vld [vmem:[#allocation7] ss:$8 sps:$4 sm:$0xff]   ;;  %vm153_vm0 = vcmask 261120   ;;  %v1067_v11 = vld [vmem:[#allocation7 + $0x14] ss:$8 sps:$4 sm:$0xff]   ;;  %643 = vmatprep.subr.bf16.mxu1 %v1064_v9  ;;  %s1305_s8 = smov [#allocation10]  }
  0x4f   :  { %v1063_v12 = vld [vmem:[#allocation5 + $0x2c] ss:$16 sps:$4 sm:$0xff]   ;;  %644 = vmatpush1.bf16.msra.mxu1 %v1066_v10  ;;  %v1069_v13 = vld [vmem:[#allocation7 + $0x10] ss:$8 sps:$4 sm:$0xff]   ;;  %v1075_v17 = vld [vmem:[#allocation7 + $0x20] ss:$8 sps:$4 sm:$0xff]  }
  0x50   :  { %645 = vmatprep.subr.bf16.mxu1 %v1067_v11  ;;  %v1070_v14 = vld [vmem:[#allocation7 + $0x24] ss:$8 sps:$4 sm:$0xff]   ;;  %v1061_v15 = vld [vmem:[#allocation5 + $0x28] ss:$16 sps:$4 sm:$0xff]   ;;  %v1076_v18 = vld [vmem:[#allocation7 + $0x34] ss:$8 sps:$4 sm:$0xff]  }
  0x51   :  { %160 = vmatpush1.bf16.msra.mxu0 %v1057_v4  ;;  %v1074_v16 = vld [vmem:[#allocation7 + $0x104] ss:$8 sps:$4 sm:$0xff]   ;;  %v1072_v19 = vld [vmem:[#allocation7 + $0x100] ss:$8 sps:$4 sm:$0xff]   ;;  %v1080_v20 = vld [vmem:[#allocation7 + $0x114] ss:$8 sps:$4 sm:$0xff]  }
  0x52   :  { %198 = vmatprep.subr.bf16.mxu0 %v1060_v6  ;;  %v1081_v21 = vld [vmem:[#allocation7 + $0x30] ss:$8 sps:$4 sm:$0xff]   ;;  %v1082_v22 = vld [vmem:[#allocation7 + $0x44] ss:$8 sps:$4 sm:$0xff]   ;;  %v1087_v25 = vld [vmem:[#allocation7 + $0x40] ss:$8 sps:$4 sm:$0xff]  }
  0x53   :  { %646 = vmatpush1.bf16.msra.mxu1 %v1069_v13  ;;  %v1078_v23 = vld [vmem:[#allocation7 + $0x110] ss:$8 sps:$4 sm:$0xff]   ;;  %v1086_v24 = vld [vmem:[#allocation7 + $0x124] ss:$8 sps:$4 sm:$0xff]   ;;  %v1088_v26 = vld [vmem:[#allocation7 + $0x54] ss:$8 sps:$4 sm:$0xff]  }
  0x54   :  { %931 = vmatmul.mubr.msk.bf16.vlgmr.msra.gmra.mrb[0].mxu0 %vm153_vm0, %v82_v8  ;;  %647 = vmatprep.subr.bf16.mxu1 %v1070_v14  ;;  %v1084_v27 = vld [vmem:[#allocation7 + $0x120] ss:$8 sps:$4 sm:$0xff]   ;;  %v1092_v28 = vld [vmem:[#allocation7 + $0x134] ss:$8 sps:$4 sm:$0xff]   ;;  %v1093_v29 = vld [vmem:[#allocation7 + $0x50] ss:$8 sps:$4 sm:$0xff]  }
  0x55   :  { %199 = vmatpush1.bf16.msra.mxu0 %v1058_v7  ;;  %230 = vmatprep.mubr.bf16.mxu0 %v1304_v0  ;;  %v1094_v30 = vld [vmem:[#allocation7 + $0x64] ss:$8 sps:$4 sm:$0xff]   ;;  %v1090_v31 = vld [vmem:[#allocation7 + $0x130] ss:$8 sps:$4 sm:$0xff]   ;;  %v1099_v33 = vld [vmem:[#allocation7 + $0x60] ss:$8 sps:$4 sm:$0xff]  }
  0x56   :  { %200 = vmatprep.subr.bf16.mxu0 %v1063_v12  ;;  %v1098_v32 = vld [vmem:[#allocation7 + $0x144] ss:$8 sps:$4 sm:$0xff]   ;;  %v1100_v34 = vld [vmem:[#allocation7 + $0x74] ss:$8 sps:$4 sm:$0xff]   ;;  %v1096_v35 = vld [vmem:[#allocation7 + $0x140] ss:$8 sps:$4 sm:$0xff]   ;;  %v93_v12 = vlaneseq }
  0x57   :  { %648 = vmatpush1.bf16.msra.mxu1 %v1075_v17  ;;  %v1104_v36 = vld [vmem:[#allocation7 + $0x154] ss:$8 sps:$4 sm:$0xff]   ;;  %v1105_v37 = vld [vmem:[#allocation7 + $0x70] ss:$8 sps:$4 sm:$0xff]   ;;  %v1106_v38 = vld [vmem:[#allocation7 + $0x84] ss:$8 sps:$4 sm:$0xff]  }
  0x58   :  { %649 = vmatprep.subr.bf16.mxu1 %v1076_v18  ;;  %v1102_v39 = vld [vmem:[#allocation7 + $0x150] ss:$8 sps:$4 sm:$0xff]   ;;  %v1110_v40 = vld [vmem:[#allocation7 + $0x164] ss:$8 sps:$4 sm:$0xff]   ;;  %v1111_v41 = vld [vmem:[#allocation7 + $0x80] ss:$8 sps:$4 sm:$0xff]  }
  0x59   :  { %201 = vmatpush1.bf16.msra.mxu0 %v1061_v15  ;;  %v1112_v42 = vld [vmem:[#allocation7 + $0x94] ss:$8 sps:$4 sm:$0xff]   ;;  %v1108_v43 = vld [vmem:[#allocation7 + $0x160] ss:$8 sps:$4 sm:$0xff]   ;;  %v1117_v45 = vld [vmem:[#allocation7 + $0x90] ss:$8 sps:$4 sm:$0xff]  }
  0x5a   :  { %684 = vmatprep.subr.bf16.mxu0 %v1074_v16  ;;  %v1116_v44 = vld [vmem:[#allocation7 + $0x174] ss:$8 sps:$4 sm:$0xff]   ;;  %v1118_v46 = vld [vmem:[#allocation7 + $0xa4] ss:$8 sps:$4 sm:$0xff]   ;;  %v1114_v47 = vld [vmem:[#allocation7 + $0x170] ss:$8 sps:$4 sm:$0xff]  }
  0x5b   :  { %650 = vmatpush1.bf16.msra.mxu1 %v1081_v21  ;;  %v1122_v48 = vld [vmem:[#allocation7 + $0x184] ss:$8 sps:$4 sm:$0xff]   ;;  %v1123_v49 = vld [vmem:[#allocation7 + $0xa0] ss:$8 sps:$4 sm:$0xff]   ;;  %v1124_v50 = vld [vmem:[#allocation7 + $0xb4] ss:$8 sps:$4 sm:$0xff]  }
  0x5c   :  { %932 = vmatmul.mubr.msk.bf16.vlgmr.msra.gmra.mrb[4].mxu0 %vm153_vm0, %v82_v8  ;;  %651 = vmatprep.subr.bf16.mxu1 %v1082_v22  ;;  %v1120_v51 = vld [vmem:[#allocation7 + $0x180] ss:$8 sps:$4 sm:$0xff]   ;;  %v1128_v52 = vld [vmem:[#allocation7 + $0x194] ss:$8 sps:$4 sm:$0xff]   ;;  %v1129_v53 = vld [vmem:[#allocation7 + $0xb0] ss:$8 sps:$4 sm:$0xff]  }
  0x5d   :  { %685 = vmatpush1.bf16.msra.mxu0 %v1072_v19  ;;  %v1130_v54 = vld [vmem:[#allocation7 + $0xc4] ss:$8 sps:$4 sm:$0xff]   ;;  %v1126_v55 = vld [vmem:[#allocation7 + $0x190] ss:$8 sps:$4 sm:$0xff]   ;;  %v1135_v57 = vld [vmem:[#allocation7 + $0xc0] ss:$8 sps:$4 sm:$0xff]  }
  0x5e   :  { %686 = vmatprep.subr.bf16.mxu0 %v1080_v20  ;;  %v1134_v56 = vld [vmem:[#allocation7 + $0x1a4] ss:$8 sps:$4 sm:$0xff]   ;;  %v1136_v58 = vld [vmem:[#allocation7 + $0xd4] ss:$8 sps:$4 sm:$0xff]   ;;  %v1132_v59 = vld [vmem:[#allocation7 + $0x1a0] ss:$8 sps:$4 sm:$0xff]  }
  0x5f   :  { %652 = vmatpush1.bf16.msra.mxu1 %v1087_v25  ;;  %v1140_v60 = vld [vmem:[#allocation7 + $0x1b4] ss:$8 sps:$4 sm:$0xff]   ;;  %v1141_v61 = vld [vmem:[#allocation7 + $0xd0] ss:$8 sps:$4 sm:$0xff]   ;;  %v1142_v63 = vld [vmem:[#allocation7 + $0xe4] ss:$8 sps:$4 sm:$0xff]  }
  0x60   :  { %653 = vmatprep.subr.bf16.mxu1 %v1088_v26  ;;  %v1138_v62 = vld [vmem:[#allocation7 + $0x1b0] ss:$8 sps:$4 sm:$0xff]   ;;  %v1146_v0 = vld [vmem:[#allocation7 + $0x1c4] ss:$8 sps:$4 sm:$0xff]   ;;  %v1144_v1 = vld [vmem:[#allocation7 + $0x1c0] ss:$8 sps:$4 sm:$0xff]  }
  0x61   :  { %687 = vmatpush1.bf16.msra.mxu0 %v1078_v23  ;;  %v1147_v2 = vld [vmem:[#allocation7 + $0xe0] ss:$8 sps:$4 sm:$0xff]   ;;  %v1148_v3 = vld [vmem:[#allocation7 + $0xf4] ss:$8 sps:$4 sm:$0xff]   ;;  %v1150_v5 = vld [vmem:[#allocation7 + $0x1d0] ss:$8 sps:$4 sm:$0xff]  }
  0x62   :  { %688 = vmatprep.subr.bf16.mxu0 %v1086_v24  ;;  %v1152_v4 = vld [vmem:[#allocation7 + $0x1d4] ss:$8 sps:$4 sm:$0xff]   ;;  %v1153_v6 = vld [vmem:[#allocation7 + $0xf0] ss:$8 sps:$4 sm:$0xff]   ;;  %v1156_v7 = vld [vmem:[#allocation7 + $0x1e4] ss:$8 sps:$4 sm:$0xff]  }
  0x63   :  { %654 = vmatpush1.bf16.msra.mxu1 %v1093_v29  ;;  %v1154_v8 = vld [vmem:[#allocation7 + $0x1e0] ss:$8 sps:$4 sm:$0xff]   ;;  %v1159_v9 = vld [vmem:[#allocation7 + $0x1f4] ss:$8 sps:$4 sm:$0xff]   ;;  %v1157_v10 = vld [vmem:[#allocation7 + $0x1f0] ss:$8 sps:$4 sm:$0xff]  }
  0x64   :  { %655 = vmatprep.subr.bf16.mxu1 %v1094_v30  ;;  %v1160_v11 = vld [vmem:[#allocation8 + $0x40] sm:$0xff]   ;;  %v1396_v13 = vshrl.u32 %v93_v12, 7  ;;  %v91_v15 = vld [vmem:[%s1433_s2] sm:$0xf]  ;;  %s912_s9 = sshll.u32 %s1305_s8, 4  ;;  %s913_s9 = int_to_ptr.vmem [resolvable:$true] %s912_s9 }
  0x65   :  { %689 = vmatpush1.bf16.msra.mxu0 %v1084_v27  ;;  %s1264_s10 = scalar_lea.vmem %s913_s9, 64  ;;  %p1269_p5 = scmp.lt.s32.totalorder %s913_s9, %s913_s9 }
  0x66   :  { %690 = vmatprep.subr.bf16.mxu0 %v1092_v28  ;;  %v95_v14 = vsub.s32 0, %v1396_v13  ;;  %v99_v16 = vsub.s32 1, %v1396_v13  ;;  %v103_v22 = vsub.s32 2, %v1396_v13  ;;  %v107_v25 = vsub.s32 3, %v1396_v13  ;;  %v997_v13 = vld [vmem:[%s1437_s6] ss:$0 sm:$0xff]  ;;  %p1265_p4 = scmp.ne.s32.totalorder %s913_s9, %s1264_s10  ;;  %p1270_p6 = scmp.lt.s32.totalorder %s1264_s10, %s1264_s10 }
  0x67   :  { %656 = vmatpush1.bf16.msra.mxu1 %v1099_v33 }
  0x68   :  { %657 = vmatprep.subr.bf16.mxu1 %v1100_v34  ;;  %v96_v17 = vrot.slane %v91_v15, %v95_v14  ;;  %v100_v18 = vrot.slane %v91_v15, %v99_v16  ;;  %v104_v29 = vrot.slane %v91_v15, %v103_v22  ;;  %v1162_v34 = vld [vmem:[#allocation8 + $0x48] sm:$0xff]   ;;  %p1271_p7 = por %p1270_p6, %p1269_p5 }
  0x69   :  { %691 = vmatpush1.bf16.msra.mxu0 %v1090_v31  ;;  %v108_v31 = vrot.slane %v91_v15, %v107_v25 }
  0x6a   :  { %692 = vmatprep.subr.bf16.mxu0 %v1098_v32  ;;  %v1161_v32 = vld [vmem:[#allocation8] sm:$0xff]   ;;  %p1272_p8 = pnand %p1271_p7, %p1265_p4 }
  0x6b   :  { %658 = vmatpush1.bf16.msra.mxu1 %v1105_v37 }
  0x6c   :  { %659 = vmatprep.subr.bf16.mxu1 %v1106_v38 }
  0x6d   :  { %693 = vmatpush1.bf16.msra.mxu0 %v1096_v35 }
  0x6e   :  { %694 = vmatprep.subr.bf16.mxu0 %v1104_v36 }
  0x6f   :  { %660 = vmatpush1.bf16.msra.mxu1 %v1111_v41 }
  0x70   :  { %661 = vmatprep.subr.bf16.mxu1 %v1112_v42 }
  0x71   :  { %695 = vmatpush1.bf16.msra.mxu0 %v1102_v39 }
  0x72   :  { %696 = vmatprep.subr.bf16.mxu0 %v1110_v40  ;;  %v1163_v40 = vld [vmem:[#allocation8 + $0x8] sm:$0xff]  }
  0x73   :  { %662 = vmatpush1.bf16.msra.mxu1 %v1117_v45 }
  0x74   :  { %663 = vmatprep.subr.bf16.mxu1 %v1118_v46  ;;  %v1165_v46 = vld [vmem:[#allocation8 + $0x10] sm:$0xff]  }
  0x75   :  { %697 = vmatpush1.bf16.msra.mxu0 %v1108_v43  ;;  %v1164_v43 = vld [vmem:[#allocation8 + $0x50] sm:$0xff]  }
  0x76   :  { %698 = vmatprep.subr.bf16.mxu0 %v1116_v44 }
  0x77   :  { %664 = vmatpush1.bf16.msra.mxu1 %v1123_v49  ;;  %v1167_v49 = vld [vmem:[#allocation8 + $0x18] sm:$0xff]  }
  0x78   :  { %665 = vmatprep.subr.bf16.mxu1 %v1124_v50  ;;  %v1168_v50 = vld [vmem:[#allocation8 + $0x60] sm:$0xff]  }
  0x79   :  { %699 = vmatpush1.bf16.msra.mxu0 %v1114_v47 }
  0x7a   :  { %700 = vmatprep.subr.bf16.mxu0 %v1122_v48  ;;  %v1166_v48 = vld [vmem:[#allocation8 + $0x58] sm:$0xff]  }
  0x7b   :  { %666 = vmatpush1.bf16.msra.mxu1 %v1129_v53  ;;  %v1171_v53 = vld [vmem:[#allocation8 + $0x28] sm:$0xff]  }
  0x7c   :  { %667 = vmatprep.subr.bf16.mxu1 %v1130_v54  ;;  %v1172_v54 = vld [vmem:[#allocation8 + $0x70] sm:$0xff]  }
  0x7d   :  { %701 = vmatpush1.bf16.msra.mxu0 %v1120_v51  ;;  %v1169_v51 = vld [vmem:[#allocation8 + $0x20] sm:$0xff]  }
  0x7e   :  { %702 = vmatprep.subr.bf16.mxu0 %v1128_v52  ;;  %v1170_v52 = vld [vmem:[#allocation8 + $0x68] sm:$0xff]  }
  0x7f   :  { %668 = vmatpush1.bf16.msra.mxu1 %v1135_v57  ;;  %v1175_v57 = vld [vmem:[#allocation8 + $0x38] sm:$0xff]  }
  0x80   :  { %669 = vmatprep.subr.bf16.mxu1 %v1136_v58  ;;  %v311_v58 = vld [vmem:[%s1435_s4] sm:$0x3] }
  0x81   :  { %703 = vmatpush1.bf16.msra.mxu0 %v1126_v55  ;;  %v1173_v55 = vld [vmem:[#allocation8 + $0x30] sm:$0xff]  }
  0x82   :  { %704 = vmatprep.subr.bf16.mxu0 %v1134_v56  ;;  %v1174_v56 = vld [vmem:[#allocation8 + $0x78] sm:$0xff]  }
  0x83   :  { %670 = vmatpush1.bf16.msra.mxu1 %v1141_v61 }
  0x84   :  { %671 = vmatprep.subr.bf16.mxu1 %v1142_v63 }
  0x85   :  { %705 = vmatpush1.bf16.msra.mxu0 %v1132_v59 }
  0x86   :  { %706 = vmatprep.subr.bf16.mxu0 %v1140_v60 }
  0x87   :  { %672 = vmatpush1.bf16.msra.mxu1 %v1147_v2 }
  0x88   :  { %673 = vmatprep.subr.bf16.mxu1 %v1148_v3 }
  0x89   :  { %707 = vmatpush1.bf16.msra.mxu0 %v1138_v62  ;;  %v316_v62 = vrot.slane %v311_v58, %v95_v14 }
  0x8a   :  { %708 = vmatprep.subr.bf16.mxu0 %v1146_v0  ;;  %v320_v0 = vrot.slane %v311_v58, %v99_v16 }
  0x8b   :  { %674 = vmatpush1.bf16.msra.mxu1 %v1153_v6 }
  0x8c   :  { %1014 = vmatprep.subr.bf16.mxu1 %v1160_v11 }
  0x8d   :  { %709 = vmatpush1.bf16.msra.mxu0 %v1144_v1 }
  0x8e   :  { %710 = vmatprep.subr.bf16.mxu0 %v1152_v4 }
  0x91   :  { %711 = vmatpush1.bf16.msra.mxu0 %v1150_v5 }
  0x92   :  { %712 = vmatprep.subr.bf16.mxu0 %v1156_v7 }
  0x95   :  { %713 = vmatpush1.bf16.msra.mxu0 %v1154_v8 }
  0x96   :  { %714 = vmatprep.subr.bf16.mxu0 %v1159_v9 }
  0x99   :  { %715 = vmatpush1.bf16.msra.mxu0 %v1157_v10 }
 0x127   :  { %v191_v19 = vpop.f32.mrb[0].mxu0 }
 0x128   :  { %v192_v20 = vadd.f32 %v191_v19, %v96_v17  ;;  %v193_v21 = vpop.f32.mrb[1].mxu0 }
 0x129   :  { %v194_v23 = vadd.f32 %v193_v21, %v100_v18  ;;  %v195_v24 = vpop.f32.mrb[2].mxu0 }
 0x12a   :  { %v239_v26 = vmax.f32 %v192_v20, 0.0  ;;  %v196_v27 = vpop.f32.mrb[3].mxu0 }
 0x12b   :  { %v240_v28 = vmax.f32 %v194_v23, 0.0 }
 0x12c   :  { %v243_v33 = vpack.c.bf16 %v239_v26, %v239_v26 }
 0x12d   :  { %v244_v30 = vpack.c.bf16 %v240_v28, %v240_v28 }
 0x12f   :  { %v232_v35 = vpop.f32.mrb[4].mxu0  ;;  %675 = vmatprep.mubr.bf16.mxu1 %v244_v30 }
 0x130   :  { %v233_v36 = vadd.f32 %v232_v35, %v104_v29  ;;  %v234_v37 = vpop.f32.mrb[5].mxu0  ;;  %676 = vmatmul.mubr.bf16.vlgmr.msra.gmra.mrb[0].mxu1 %v243_v33 }
 0x131   :  { %v235_v38 = vadd.f32 %v234_v37, %v108_v31  ;;  %v236_v39 = vpop.f32.mrb[6].mxu0  ;;  %1015 = vmatpush3.bf16.msra.mxu1 %v1161_v32 }
 0x132   :  { %v241_v41 = vmax.f32 %v233_v36, 0.0  ;;  %v237_v42 = vpop.f32.mrb[7].mxu0  ;;  %1016 = vmatprep.subr.bf16.mxu1 %v1162_v34 }
 0x133   :  { %v242_v44 = vmax.f32 %v235_v38, 0.0 }
 0x134   :  { %v245_v47 = vpack.c.bf16 %v241_v41, %v241_v41 }
 0x135   :  { %v246_v45 = vpack.c.bf16 %v242_v44, %v242_v44  ;;  %1017 = vmatpush3.bf16.msra.mxu1 %v1163_v40 }
 0x136   :  { %1018 = vmatprep.subr.bf16.mxu1 %v1164_v43 }
 0x137   :  { %716 = vmatprep.mubr.bf16.mxu0 %v246_v45 }
 0x138   :  { %717 = vmatmul.mubr.bf16.vlgmr.msra.gmra.mrb[8].mxu0 %v245_v47 }
 0x139   :  { %1019 = vmatpush3.bf16.msra.mxu1 %v1165_v46 }
 0x13a   :  { %1020 = vmatprep.subr.bf16.mxu1 %v1166_v48 }
 0x13d   :  { %1021 = vmatpush3.bf16.msra.mxu1 %v1167_v49 }
 0x13e   :  { %1022 = vmatprep.subr.bf16.mxu1 %v1168_v50 }
 0x141   :  { %1023 = vmatpush3.bf16.msra.mxu1 %v1169_v51 }
 0x142   :  { %1024 = vmatprep.subr.bf16.mxu1 %v1170_v52 }
 0x145   :  { %1025 = vmatpush3.bf16.msra.mxu1 %v1171_v53 }
 0x146   :  { %1026 = vmatprep.subr.bf16.mxu1 %v1172_v54 }
 0x149   :  { %1027 = vmatpush3.bf16.msra.mxu1 %v1173_v55 }
 0x14a   :  { %1028 = vmatprep.subr.bf16.mxu1 %v1174_v56 }
 0x14d   :  { %1029 = vmatpush3.bf16.msra.mxu1 %v1175_v57 }
 0x203   :  { %v677_v59 = vpop.f32.mrb[0].mxu1 }
 0x204   :  { %v679_v60 = vpop.f32.mrb[1].mxu1  ;;  %v678_v1 = vadd.f32 %v677_v59, %v316_v62 }
 0x205   :  { %v681_v61 = vpop.f32.mrb[2].mxu1  ;;  %v680_v2 = vadd.f32 %v679_v60, %v320_v0 }
 0x206   :  { %v682_v63 = vpop.f32.mrb[3].mxu1 }
 0x20b   :  { %v718_v3 = vpop.f32.mrb[8].mxu0 }
 0x20c   :  { %v719_v4 = vadd.f32 %v718_v3, %v678_v1  ;;  %v720_v5 = vpop.f32.mrb[9].mxu0 }
 0x20d   :  { %v721_v6 = vadd.f32 %v720_v5, %v680_v2  ;;  %v722_v7 = vpop.f32.mrb[10].mxu0 }
 0x20e   :  { %v725_v8 = vmax.f32 %v719_v4, 0.0  ;;  %v723_v9 = vpop.f32.mrb[11].mxu0 }
 0x20f   :  { %v726_v10 = vmax.f32 %v721_v6, 0.0 }
 0x210   :  { %v727_v12 = vpack.c.bf16 %v725_v8, %v725_v8 }
 0x211   :  { %v728_v11 = vpack.c.bf16 %v726_v10, %v726_v10 }
 0x213   :  { %896 = vmatprep.mubr.bf16.mxu1 %v728_v11 }
 0x214   :  { %897 = vmatmul.mubr.bf16.vlgmr.msra.gmra.mrb[4].mxu1 %v727_v12 }
 0x2e7   :  { %v1030_v15 = vpop.f32.mrb[4].mxu1 }
 0x2e8   :  { %v1031_v14 = vpop.f32.mrb[5].mxu1 }
 0x2e9   :  { %v1032_v16 = vadd.f32 %v1031_v14, %v1030_v15  ;;  %v1033_v17 = vpop.f32.mrb[6].mxu1 }
 0x2ea   :  { %v1034_v18 = vpop.f32.mrb[7].mxu1 }
 0x2eb   :  { %v899_v19 = vadd.f32 %v1032_v16, %v997_v13 }
 0x2ed   :  { %v904_v20 = vpack.c.bf16 %v899_v19, %v899_v19 }
 0x2ef   :  { %905 = vst [vmem:[#allocation10] sm:$0xf] %v904_v20 }
 0x2f0   :  { %1275 = shalt.err (!%p1272_p8)
}
 0x2f1   :  { %s1276_s6 = scalar_lea.hbm %s1438_s7, 64 }
 0x2f2   :  { %p1277_p9 = scmp.ne.s32.totalorder %s1438_s7, %s1276_s6  ;;  %p1280_p10 = scmp.lt.u32.totalorder %s1276_s6, %s1438_s7 }
 0x2f4   :  { %p1282_p11 = pnand %p1280_p10, %p1277_p9 }
 0x2f6   :  { %1285 = shalt.err (!%p1282_p11)
}
 0x2f7   :  { %915 = dma.vmem_to_hbm [thread:$0]  %s913_s9, 64, %s1438_s7, [#allocation4]  }
 0x2f8   :  { %1292 = dma.done.wait [#allocation4], 64  }
 0x2f9   :  { %1293 = vsyncadd [#allocation4], 4294967232 }
 0x2fa   :  { %919 = vsyncpa [#allocation3], 1 }
 0x2fb   :  { %920 = vsyncpa [#allocation6], 1 }
 0x2fc   :  { %921 = vsyncpa [#allocation9], 1 }
 0x2fd   :  { %922 = vsyncpa [#allocation4], 1 }

</bundles_post_ra>
